<compile_context>
chip_gen: v7x
topology: tpu7x:2x2x1
jax: 0.10.0
libtpu: 0.0.40
codegen_flags: <defaults>
</compile_context>

<pallas_src>
import functools

import jax
import jax.numpy as jnp
import numpy as np
from jax import lax
from jax.experimental import pallas as pl
from jax.experimental.pallas import tpu as pltpu

K = 3  # kernel size of every conv in the block


def _round_up(x, m):
    return (x + m - 1) // m * m


def _vmem_capacity_bytes():
    try:
        info = pltpu.get_tpu_info()
        return int(getattr(info, "vmem_capacity_bytes", 128 * 1024 * 1024))
    except Exception:
        return 128 * 1024 * 1024  # v5e/v6e default; v7x has 64 MiB


def _pick_b_tile(n, stride, c_pad, kc_in):
    """VMEM-budgeted batch tile: target 1K-4K row MXU slabs, keep >= 2 grid steps."""
    phys = _vmem_capacity_bytes()
    budget = min(phys * 3 // 8, 48 * 1024 * 1024)        # ~24 MiB on v7x, 48 MiB on v5e/v6e
    lanes_in = _round_up(max(kc_in, 1), 128)
    lanes = _round_up(c_pad, 128)
    # 2x double-buffered input + 2x double-buffered output + ~6 live f32 intermediates per row.
    bytes_per_row = (2 * lanes_in + (2 + 6) * lanes) * 4
    weights_bytes = 2 * (2 * K * c_pad * c_pad + kc_in * c_pad + 3 * c_pad) * 4
    rows = max(stride, (budget - weights_bytes) // bytes_per_row)
    rows = min(rows, 4096)                               # 1K-4K row slabs; bounds per-step latency
    b_tile = max(1, rows // stride)
    b_tile = max(1, min(b_tile, (n + 1) // 2))           # >=2 grid steps -> megacore sharding
    return b_tile, phys


def decoder_block_pallas(x_ncl, params, *, compute_dtype=jnp.float32, return_nlc=False):
    """x_ncl: (N, Cin, L) float32 (PyTorch NCL). Returns (N, 8*out_dconv, L+3) (or NLC)."""
    wd, bd, w1, b1, w2, b2 = params
    n, c_in, l_in = x_ncl.shape
    c_mid = wd.shape[1]                      # ConvTranspose1d weight: (Cin, Cmid, K)
    l_out = l_in + K
    c_pad = _round_up(c_mid, 128)            # lane-dense channel dim
    # "+1" is load-bearing: it guarantees >=1 zero tail row per element, so rolled conv taps
    # that wrap across element boundaries read zeros (== the pad=1 boundary condition).
    stride = _round_up(l_out + 1, 8)
    kc_in = K * c_in

    b_tile, phys_vmem = _pick_b_tile(n, stride, c_pad, kc_in)
    n_pad = _round_up(n, b_tile)
    r_tile = b_tile * stride
    r_total = n_pad * stride

    # ----- host-side glue: layout, zero tails, deconv im2col, channel zero-padding -----
    x_nlc = jnp.transpose(x_ncl, (0, 2, 1))                           # (N, L, Cin)
    if n_pad != n:
        x_nlc = jnp.pad(x_nlc, ((0, n_pad - n), (0, 0), (0, 0)))
    # ConvTranspose1d(stride=1, pad=0, output_padding=1) == regular conv over x zero-padded
    # (2, 3) with the kernel flipped along K and in/out channels swapped.  Build that conv's
    # im2col operand on the host (also provides the zero tail rows between elements).
    xp = jnp.pad(x_nlc, ((0, 0), (2, stride - l_in), (0, 0)))         # (n_pad, stride+2, Cin)
    xcat = jnp.concatenate([xp[:, k:k + stride] for k in range(K)], axis=-1)
    xcat = xcat.reshape(r_total, kc_in).astype(compute_dtype)

    # Deconv weight (Cin, Cmid, K) -> flipped im2col form (K*Cin, Cpad); row index = k*Cin + c.
    wd_cat = jnp.transpose(wd[:, :, ::-1], (2, 0, 1)).reshape(kc_in, c_mid)
    wd_cat = jnp.pad(wd_cat, ((0, 0), (0, c_pad - c_mid))).astype(compute_dtype)

    def conv_w_taps(w):                      # Conv1d (Cout, Cin, K) -> per-tap (K, Cpad, Cpad)
        wf = jnp.transpose(w, (2, 1, 0))                              # (K, Cin, Cout)
        wf = jnp.pad(wf, ((0, 0), (0, c_pad - c_mid), (0, c_pad - c_mid)))
        return wf.astype(compute_dtype)

    def pad_bias(b):
        return jnp.pad(b, (0, c_pad - c_mid)).reshape(1, c_pad).astype(jnp.float32)

    w1t, w2t = conv_w_taps(w1), conv_w_taps(w2)
    bdp, b1p, b2p = pad_bias(bd), pad_bias(b1), pad_bias(b2)

    # ----- kernel -----------------------------------------------------------------------
    def kernel(xcat_ref, wd_ref, bd_ref, w1_ref, b1_ref, w2_ref, b2_ref, out_ref):
        rows = lax.broadcasted_iota(jnp.int32, (r_tile, 1), 0) % stride
        valid = rows < l_out                 # real output rows vs. zero tail rows

        def conv3_relu(v, w_ref, b_row):
            # K=3, pad=1 conv as three accumulated per-tap MXU dots (taps via XLU roll);
            # the zero tail rows between elements stand in for the boundary padding.
            y = jnp.dot(pltpu.roll(v, 1, axis=0).astype(compute_dtype), w_ref[0],
                        preferred_element_type=jnp.float32)
            y = y + jnp.dot(v.astype(compute_dtype), w_ref[1],
                            preferred_element_type=jnp.float32)
            y = y + jnp.dot(pltpu.roll(v, r_tile - 1, axis=0).astype(compute_dtype), w_ref[2],
                            preferred_element_type=jnp.float32)
            y = jnp.maximum(y + b_row, 0.0)
            return jnp.where(valid, y, 0.0)  # keep tail rows exactly zero

        # ---- ConvTranspose1d: ONE matmul over the host-built im2col operand ----
        h = jnp.dot(xcat_ref[...], wd_ref[...], preferred_element_type=jnp.float32)
        h = jnp.where(valid, h + bd_ref[...], 0.0)
        # ---- Dropout(0.5): identity in eval/inference mode ----
        # ---- Conv1d(pad=1) + ReLU, twice ----
        g = conv3_relu(h, w1_ref, b1_ref[...])
        o = conv3_relu(g, w2_ref, b2_ref[...])
        out_ref[...] = o.astype(out_ref.dtype)

    itemsize = jnp.dtype(compute_dtype).itemsize
    flops = 2 * r_total * c_pad * (kc_in + 2 * K * c_pad)
    bytes_accessed = (r_total * kc_in * itemsize + r_total * c_pad * 4
                      + (kc_in + 2 * K * c_pad) * c_pad * itemsize + 3 * c_pad * 4)

    out_flat = pl.pallas_call(
        kernel,
        out_shape=jax.ShapeDtypeStruct((r_total, c_pad), jnp.float32),
        grid_spec=pltpu.PrefetchScalarGridSpec(
            num_scalar_prefetch=0,
            grid=(n_pad // b_tile,),
            in_specs=[
                pl.BlockSpec((r_tile, kc_in), lambda b: (b, 0)),
                pl.BlockSpec((kc_in, c_pad), lambda b: (0, 0)),
                pl.BlockSpec((1, c_pad), lambda b: (0, 0)),
                pl.BlockSpec((K, c_pad, c_pad), lambda b: (0, 0, 0)),
                pl.BlockSpec((1, c_pad), lambda b: (0, 0)),
                pl.BlockSpec((K, c_pad, c_pad), lambda b: (0, 0, 0)),
                pl.BlockSpec((1, c_pad), lambda b: (0, 0)),
            ],
            out_specs=pl.BlockSpec((r_tile, c_pad), lambda b: (b, 0)),
        ),
        compiler_params=pltpu.CompilerParams(
            dimension_semantics=("parallel",),
            vmem_limit_bytes=int(min(phys_vmem * 3 // 4, 100 * 1024 * 1024)),
        ),
        cost_estimate=pl.CostEstimate(flops=int(flops), transcendentals=0,
                                      bytes_accessed=int(bytes_accessed)),
    )(xcat, wd_cat, bdp, w1t, b1p, w2t, b2p)

    out = out_flat.reshape(n_pad, stride, c_pad)[:n, :l_out, :c_mid]  # drop all padding
    if return_nlc:
        return out                                                    # (N, L+3, Cmid)
    return jnp.transpose(out, (0, 2, 1))                              # (N, Cmid, L+3)


def decoder_block_ref(x_ncl, params):
    """Independent pure-JAX reference (lax.conv_general_dilated), NCL layout."""
    wd, bd, w1, b1, w2, b2 = params
    dn = ("NCH", "OIH", "NCH")
    # ConvTranspose1d(stride=1, pad=0, output_padding=1) == conv over pad (2, 3)
    # with kernel flipped along K and in/out channels swapped.
    wd_oih = jnp.flip(jnp.transpose(wd, (1, 0, 2)), axis=2)
    h = lax.conv_general_dilated(x_ncl, wd_oih, (1,), ((2, 3),),
                                 dimension_numbers=dn) + bd[None, :, None]
    # Dropout: identity (eval)
    g = lax.conv_general_dilated(h, w1, (1,), ((1, 1),),
                                 dimension_numbers=dn) + b1[None, :, None]
    g = jnp.maximum(g, 0.0)
    o = lax.conv_general_dilated(g, w2, (1,), ((1, 1),),
                                 dimension_numbers=dn) + b2[None, :, None]
    return jnp.maximum(o, 0.0)


def init_params(key, in_dconv, out_dconv):
    c_mid = 8 * out_dconv
    ks = jax.random.split(key, 6)
    s = 0.1
    wd = s * jax.random.normal(ks[0], (in_dconv, c_mid, K), jnp.float32)  # ConvTranspose1d: (Cin, Cout, K)
    bd = s * jax.random.normal(ks[1], (c_mid,), jnp.float32)
    w1 = s * jax.random.normal(ks[2], (c_mid, c_mid, K), jnp.float32)     # Conv1d: (Cout, Cin, K)
    b1 = s * jax.random.normal(ks[3], (c_mid,), jnp.float32)
    w2 = s * jax.random.normal(ks[4], (c_mid, c_mid, K), jnp.float32)
    b2 = s * jax.random.normal(ks[5], (c_mid,), jnp.float32)
    return (wd, bd, w1, b1, w2, b2)


if __name__ == "__main__":
    in_dconv, out_dconv = 4, 2        # C_mid = 16
    N, L = 2, 8

    key = jax.random.PRNGKey(0)
    k_x, k_p = jax.random.split(key)
    x = jax.random.normal(k_x, (N, in_dconv, L), jnp.float32)   # PyTorch NCL input
    params = init_params(k_p, in_dconv, out_dconv)

    ref = jax.block_until_ready(decoder_block_ref(x, params))

    # f32 path (default): matches the reference tightly.
    out = jax.block_until_ready(jax.jit(decoder_block_pallas)(x, params))
    assert out.shape == (N, 8 * out_dconv, L + K), out.shape
    np.testing.assert_allclose(np.asarray(out), np.asarray(ref), rtol=2e-5, atol=2e-5)

    # bf16-MXU path (native MXU rate on v5e/v6e/v7x): looser tolerance vs. the f32 reference.
    out_bf16 = jax.block_until_ready(
        jax.jit(functools.partial(decoder_block_pallas, compute_dtype=jnp.bfloat16))(x, params))
    np.testing.assert_allclose(np.asarray(out_bf16), np.asarray(ref), rtol=3e-2, atol=3e-2)

    print("KERNEL_OK")
</pallas_src>

<mosaic_0001>
module attributes {stable_mosaic.version = 11 : i64} {
  func.func @kernel(%arg0: i32, %arg1: memref<16x12xf32, #tpu.memory_space<vmem>>, %arg2: memref<12x128xf32, #tpu.memory_space<vmem>>, %arg3: memref<1x128xf32, #tpu.memory_space<vmem>>, %arg4: memref<3x128x128xf32, #tpu.memory_space<vmem>>, %arg5: memref<1x128xf32, #tpu.memory_space<vmem>>, %arg6: memref<3x128x128xf32, #tpu.memory_space<vmem>>, %arg7: memref<1x128xf32, #tpu.memory_space<vmem>>, %arg8: memref<16x128xf32, #tpu.memory_space<vmem>>) attributes {dimension_semantics = [#tpu.dimension_semantics<parallel>], iteration_bounds = array<i64: 2>, scalar_prefetch = 0 : i64, scratch_operands = 0 : i64, tpu.core_type = #tpu.core_type<tc>, window_params = [{transform_indices = @transform_0, window_bounds = array<i64: 16, 12>}, {pipeline_mode = #tpu.pipeline_mode<synchronous>, transform_indices = @transform_1, window_bounds = array<i64: 12, 128>}, {pipeline_mode = #tpu.pipeline_mode<synchronous>, transform_indices = @transform_2, window_bounds = array<i64: 1, 128>}, {pipeline_mode = #tpu.pipeline_mode<synchronous>, transform_indices = @transform_3, window_bounds = array<i64: 3, 128, 128>}, {pipeline_mode = #tpu.pipeline_mode<synchronous>, transform_indices = @transform_4, window_bounds = array<i64: 1, 128>}, {pipeline_mode = #tpu.pipeline_mode<synchronous>, transform_indices = @transform_5, window_bounds = array<i64: 3, 128, 128>}, {pipeline_mode = #tpu.pipeline_mode<synchronous>, transform_indices = @transform_6, window_bounds = array<i64: 1, 128>}, {transform_indices = @transform_7, window_bounds = array<i64: 16, 128>}]} {
    %0 = tpu.iota {dimensions = array<i32: 0>} : vector<16x1xi32>
    %c16_i32 = arith.constant 16 : i32
    %c0_i32 = arith.constant 0 : i32
    %1 = arith.cmpi eq, %c16_i32, %c0_i32 : i32
    %c1_i32 = arith.constant 1 : i32
    %2 = arith.select %1, %c1_i32, %c16_i32 : i32
    %3 = vector.broadcast %2 : i32 to vector<16x1xi32>
    %4 = arith.remsi %0, %3 : vector<16x1xi32>
    %c0_i32_0 = arith.constant 0 : i32
    %5 = vector.broadcast %c0_i32_0 : i32 to vector<16x1xi32>
    %6 = arith.cmpi ne, %4, %5 : vector<16x1xi32>
    %c0_i32_1 = arith.constant 0 : i32
    %7 = vector.broadcast %c0_i32_1 : i32 to vector<16x1xi32>
    %8 = arith.cmpi slt, %4, %7 : vector<16x1xi32>
    %c0_i32_2 = arith.constant 0 : i32
    %9 = arith.cmpi slt, %2, %c0_i32_2 : i32
    %10 = vector.broadcast %9 : i1 to vector<16x1xi1>
    %11 = vector.broadcast %10 : vector<16x1xi1> to vector<16x1xi1>
    %12 = arith.xori %8, %11 : vector<16x1xi1>
    %13 = arith.andi %12, %6 : vector<16x1xi1>
    %14 = vector.broadcast %2 : i32 to vector<16x1xi32>
    %15 = arith.addi %4, %14 : vector<16x1xi32>
    %16 = arith.select %13, %15, %4 : vector<16x1xi1>, vector<16x1xi32>
    %c11_i32 = arith.constant 11 : i32
    %17 = vector.broadcast %c11_i32 : i32 to vector<16x1xi32>
    %18 = arith.cmpi slt, %16, %17 : vector<16x1xi32>
    %c0 = arith.constant 0 : index
    %c0_3 = arith.constant 0 : index
    %19 = vector.load %arg1[%c0, %c0_3] : memref<16x12xf32, #tpu.memory_space<vmem>>, vector<16x12xf32>
    %c0_4 = arith.constant 0 : index
    %c0_5 = arith.constant 0 : index
    %20 = vector.load %arg2[%c0_4, %c0_5] : memref<12x128xf32, #tpu.memory_space<vmem>>, vector<12x128xf32>
    %cst = arith.constant dense<0.000000e+00> : vector<16x128xf32>
    %21 = tpu.matmul %19, %20, %cst {dimension_numbers = #tpu.dot_dimension_numbers<[1], [0], [0], [1], [0, 0, 1, 1], [], []>} : vector<16x12xf32>, vector<12x128xf32>, vector<16x128xf32> -> vector<16x128xf32>
    %c0_6 = arith.constant 0 : index
    %c0_7 = arith.constant 0 : index
    %22 = vector.load %arg3[%c0_6, %c0_7] : memref<1x128xf32, #tpu.memory_space<vmem>>, vector<1x128xf32>
    %23 = vector.broadcast %22 : vector<1x128xf32> to vector<16x128xf32>
    %24 = arith.addf %21, %23 : vector<16x128xf32>
    %cst_8 = arith.constant 0.000000e+00 : f32
    %25 = vector.shape_cast %18 : vector<16x1xi1> to vector<16x1xi1>
    %26 = vector.broadcast %25 : vector<16x1xi1> to vector<16x128xi1>
    %27 = vector.broadcast %cst_8 : f32 to vector<16x128xf32>
    %28 = arith.select %26, %24, %27 : vector<16x128xi1>, vector<16x128xf32>
    %c0_9 = arith.constant 0 : index
    %c0_10 = arith.constant 0 : index
    %29 = vector.load %arg5[%c0_9, %c0_10] : memref<1x128xf32, #tpu.memory_space<vmem>>, vector<1x128xf32>
    %c1_i32_11 = arith.constant 1 : i32
    %30 = tpu.dynamic_rotate %28 by %c1_i32_11 dim 0 : vector<16x128xf32>, i32 -> vector<16x128xf32>
    %c0_12 = arith.constant 0 : index
    %c0_13 = arith.constant 0 : index
    %c0_14 = arith.constant 0 : index
    %31 = vector.load %arg4[%c0_12, %c0_13, %c0_14] : memref<3x128x128xf32, #tpu.memory_space<vmem>>, vector<1x128x128xf32>
    %32 = vector.shape_cast %31 : vector<1x128x128xf32> to vector<128x128xf32>
    %cst_15 = arith.constant dense<0.000000e+00> : vector<16x128xf32>
    %33 = tpu.matmul %30, %32, %cst_15 {dimension_numbers = #tpu.dot_dimension_numbers<[1], [0], [0], [1], [0, 0, 1, 1], [], []>} : vector<16x128xf32>, vector<128x128xf32>, vector<16x128xf32> -> vector<16x128xf32>
    %c1 = arith.constant 1 : index
    %c0_16 = arith.constant 0 : index
    %c0_17 = arith.constant 0 : index
    %34 = vector.load %arg4[%c1, %c0_16, %c0_17] : memref<3x128x128xf32, #tpu.memory_space<vmem>>, vector<1x128x128xf32>
    %35 = vector.shape_cast %34 : vector<1x128x128xf32> to vector<128x128xf32>
    %cst_18 = arith.constant dense<0.000000e+00> : vector<16x128xf32>
    %36 = tpu.matmul %28, %35, %cst_18 {dimension_numbers = #tpu.dot_dimension_numbers<[1], [0], [0], [1], [0, 0, 1, 1], [], []>} : vector<16x128xf32>, vector<128x128xf32>, vector<16x128xf32> -> vector<16x128xf32>
    %37 = arith.addf %33, %36 : vector<16x128xf32>
    %c15_i32 = arith.constant 15 : i32
    %38 = tpu.dynamic_rotate %28 by %c15_i32 dim 0 : vector<16x128xf32>, i32 -> vector<16x128xf32>
    %c2 = arith.constant 2 : index
    %c0_19 = arith.constant 0 : index
    %c0_20 = arith.constant 0 : index
    %39 = vector.load %arg4[%c2, %c0_19, %c0_20] : memref<3x128x128xf32, #tpu.memory_space<vmem>>, vector<1x128x128xf32>
    %40 = vector.shape_cast %39 : vector<1x128x128xf32> to vector<128x128xf32>
    %cst_21 = arith.constant dense<0.000000e+00> : vector<16x128xf32>
    %41 = tpu.matmul %38, %40, %cst_21 {dimension_numbers = #tpu.dot_dimension_numbers<[1], [0], [0], [1], [0, 0, 1, 1], [], []>} : vector<16x128xf32>, vector<128x128xf32>, vector<16x128xf32> -> vector<16x128xf32>
    %42 = arith.addf %37, %41 : vector<16x128xf32>
    %43 = vector.broadcast %29 : vector<1x128xf32> to vector<16x128xf32>
    %44 = arith.addf %42, %43 : vector<16x128xf32>
    %cst_22 = arith.constant 0.000000e+00 : f32
    %45 = vector.broadcast %cst_22 : f32 to vector<16x128xf32>
    %46 = arith.maximumf %44, %45 : vector<16x128xf32>
    %cst_23 = arith.constant 0.000000e+00 : f32
    %47 = vector.shape_cast %18 : vector<16x1xi1> to vector<16x1xi1>
    %48 = vector.broadcast %47 : vector<16x1xi1> to vector<16x128xi1>
    %49 = vector.broadcast %cst_23 : f32 to vector<16x128xf32>
    %50 = arith.select %48, %46, %49 : vector<16x128xi1>, vector<16x128xf32>
    %c0_24 = arith.constant 0 : index
    %c0_25 = arith.constant 0 : index
    %51 = vector.load %arg7[%c0_24, %c0_25] : memref<1x128xf32, #tpu.memory_space<vmem>>, vector<1x128xf32>
    %c1_i32_26 = arith.constant 1 : i32
    %52 = tpu.dynamic_rotate %50 by %c1_i32_26 dim 0 : vector<16x128xf32>, i32 -> vector<16x128xf32>
    %c0_27 = arith.constant 0 : index
    %c0_28 = arith.constant 0 : index
    %c0_29 = arith.constant 0 : index
    %53 = vector.load %arg6[%c0_27, %c0_28, %c0_29] : memref<3x128x128xf32, #tpu.memory_space<vmem>>, vector<1x128x128xf32>
    %54 = vector.shape_cast %53 : vector<1x128x128xf32> to vector<128x128xf32>
    %cst_30 = arith.constant dense<0.000000e+00> : vector<16x128xf32>
    %55 = tpu.matmul %52, %54, %cst_30 {dimension_numbers = #tpu.dot_dimension_numbers<[1], [0], [0], [1], [0, 0, 1, 1], [], []>} : vector<16x128xf32>, vector<128x128xf32>, vector<16x128xf32> -> vector<16x128xf32>
    %c1_31 = arith.constant 1 : index
    %c0_32 = arith.constant 0 : index
    %c0_33 = arith.constant 0 : index
    %56 = vector.load %arg6[%c1_31, %c0_32, %c0_33] : memref<3x128x128xf32, #tpu.memory_space<vmem>>, vector<1x128x128xf32>
    %57 = vector.shape_cast %56 : vector<1x128x128xf32> to vector<128x128xf32>
    %cst_34 = arith.constant dense<0.000000e+00> : vector<16x128xf32>
    %58 = tpu.matmul %50, %57, %cst_34 {dimension_numbers = #tpu.dot_dimension_numbers<[1], [0], [0], [1], [0, 0, 1, 1], [], []>} : vector<16x128xf32>, vector<128x128xf32>, vector<16x128xf32> -> vector<16x128xf32>
    %59 = arith.addf %55, %58 : vector<16x128xf32>
    %c15_i32_35 = arith.constant 15 : i32
    %60 = tpu.dynamic_rotate %50 by %c15_i32_35 dim 0 : vector<16x128xf32>, i32 -> vector<16x128xf32>
    %c2_36 = arith.constant 2 : index
    %c0_37 = arith.constant 0 : index
    %c0_38 = arith.constant 0 : index
    %61 = vector.load %arg6[%c2_36, %c0_37, %c0_38] : memref<3x128x128xf32, #tpu.memory_space<vmem>>, vector<1x128x128xf32>
    %62 = vector.shape_cast %61 : vector<1x128x128xf32> to vector<128x128xf32>
    %cst_39 = arith.constant dense<0.000000e+00> : vector<16x128xf32>
    %63 = tpu.matmul %60, %62, %cst_39 {dimension_numbers = #tpu.dot_dimension_numbers<[1], [0], [0], [1], [0, 0, 1, 1], [], []>} : vector<16x128xf32>, vector<128x128xf32>, vector<16x128xf32> -> vector<16x128xf32>
    %64 = arith.addf %59, %63 : vector<16x128xf32>
    %65 = vector.broadcast %51 : vector<1x128xf32> to vector<16x128xf32>
    %66 = arith.addf %64, %65 : vector<16x128xf32>
    %cst_40 = arith.constant 0.000000e+00 : f32
    %67 = vector.broadcast %cst_40 : f32 to vector<16x128xf32>
    %68 = arith.maximumf %66, %67 : vector<16x128xf32>
    %cst_41 = arith.constant 0.000000e+00 : f32
    %69 = vector.shape_cast %18 : vector<16x1xi1> to vector<16x1xi1>
    %70 = vector.broadcast %69 : vector<16x1xi1> to vector<16x128xi1>
    %71 = vector.broadcast %cst_41 : f32 to vector<16x128xf32>
    %72 = arith.select %70, %68, %71 : vector<16x128xi1>, vector<16x128xf32>
    %c0_42 = arith.constant 0 : index
    %c0_43 = arith.constant 0 : index
    %73 = vector.load %arg8[%c0_42, %c0_43] : memref<16x128xf32, #tpu.memory_space<vmem>>, vector<16x128xf32>
    tpu.vector_store %arg8[%c0_42, %c0_43], %72 {strides = array<i32>} : memref<16x128xf32, #tpu.memory_space<vmem>>, vector<16x128xf32>,
    return
  }
  func.func @transform_0(%arg0: i32) -> (i32, i32) {
    %c0_i32 = arith.constant 0 : i32
    %c0_i32_0 = arith.constant 0 : i32
    return %arg0, %c0_i32 : i32, i32
  }
  func.func @transform_1(%arg0: i32) -> (i32, i32) {
    %c0_i32 = arith.constant 0 : i32
    %c0_i32_0 = arith.constant 0 : i32
    %c0_i32_1 = arith.constant 0 : i32
    return %c0_i32, %c0_i32_0 : i32, i32
  }
  func.func @transform_2(%arg0: i32) -> (i32, i32) {
    %c0_i32 = arith.constant 0 : i32
    %c0_i32_0 = arith.constant 0 : i32
    %c0_i32_1 = arith.constant 0 : i32
    return %c0_i32, %c0_i32_0 : i32, i32
  }
  func.func @transform_3(%arg0: i32) -> (i32, i32, i32) {
    %c0_i32 = arith.constant 0 : i32
    %c0_i32_0 = arith.constant 0 : i32
    %c0_i32_1 = arith.constant 0 : i32
    %c0_i32_2 = arith.constant 0 : i32
    return %c0_i32, %c0_i32_0, %c0_i32_1 : i32, i32, i32
  }
  func.func @transform_4(%arg0: i32) -> (i32, i32) {
    %c0_i32 = arith.constant 0 : i32
    %c0_i32_0 = arith.constant 0 : i32
    %c0_i32_1 = arith.constant 0 : i32
    return %c0_i32, %c0_i32_0 : i32, i32
  }
  func.func @transform_5(%arg0: i32) -> (i32, i32, i32) {
    %c0_i32 = arith.constant 0 : i32
    %c0_i32_0 = arith.constant 0 : i32
    %c0_i32_1 = arith.constant 0 : i32
    %c0_i32_2 = arith.constant 0 : i32
    return %c0_i32, %c0_i32_0, %c0_i32_1 : i32, i32, i32
  }
  func.func @transform_6(%arg0: i32) -> (i32, i32) {
    %c0_i32 = arith.constant 0 : i32
    %c0_i32_0 = arith.constant 0 : i32
    %c0_i32_1 = arith.constant 0 : i32
    return %c0_i32, %c0_i32_0 : i32, i32
  }
  func.func @transform_7(%arg0: i32) -> (i32, i32) {
    %c0_i32 = arith.constant 0 : i32
    %c0_i32_0 = arith.constant 0 : i32
    return %arg0, %c0_i32 : i32, i32
  }
}

</mosaic_0001>

<bundles_post_ra>
// kernel: decoder_block_pallas.1
= control target key start
LH: loop header
LB: loop body
LE: loop exit
PB: predicated region body
PF: predicated region fallthrough
CT: control target
= control target key end

     0   :  { %12 = vsyncpa [#allocation3], 0  ;;  %s2654_s0 = inlined_call_operand.hbm [shape: f32[32,12], index: 0, kind: input, shape index: {}]   ;;  %s2655_s1 = inlined_call_operand.hbm [shape: f32[12,128], index: 1, kind: input, shape index: {}]   ;;  %s2656_s2 = inlined_call_operand.hbm [shape: f32[1,128], index: 2, kind: input, shape index: {}]   ;;  %s2657_s3 = inlined_call_operand.hbm [shape: f32[3,128,128], index: 3, kind: input, shape index: {}]   ;;  %s2658_s4 = inlined_call_operand.hbm [shape: f32[1,128], index: 4, kind: input, shape index: {}]   ;;  %s2659_s5 = inlined_call_operand.hbm [shape: f32[3,128,128], index: 5, kind: input, shape index: {}]   ;;  %s2660_s6 = inlined_call_operand.hbm [shape: f32[1,128], index: 6, kind: input, shape index: {}]   ;;  %s2661_s7 = inlined_call_operand.hbm [shape: f32[32,128], index: 7, kind: output, shape index: {}]  }
   0x1   :  { %14 = vsyncpa [#allocation3 + $0x1], 0 }
   0x2   :  { %15 = vsyncpa [#allocation6], 0 }
   0x3   :  { %16 = vsyncpa [#allocation9], 0 }
   0x4   :  { %17 = vsyncpa [#allocation12], 0 }
   0x5   :  { %18 = vsyncpa [#allocation4], 0 }
   0x6   :  { %20 = vsyncpa [#allocation4 + $0x1], 0  ;;  %s2270_s24 = smov 0   ;;  %s2272_s25 = smov 0  }
   0x7   :  { %s2274_s26 = smov 0   ;;  %s2276_s27 = smov 0  }
   0x8 LB: > { %s2217_s28 = smov [#allocation5]   ;;  %s2291_s30 = sadd.s32 4294967295, %s2215_s27   ;;  %s2215_s27 = sphi %s2276_s27, %s2691_s27   ;;  %s2211_s26 = sphi %s2274_s26, %s2690_s26   ;;  %s2207_s25 = sphi %s2272_s25, %s2689_s25   ;;  %s2203_s24 = sphi %s2270_s24, %s2688_s24  }
   0x9   : > { %s221_s29 = sshll.u32 %s2217_s28, 4  ;;  %p1257_p0 = scmp.ge.s32.totalorder %s2215_s27, 1  ;;  %s2296_s29 = int_to_ptr.vmem [resolvable:$true] %s221_s29 }
   0xa   : > { %p2662_p1 = scmp.eq.s32.totalorder %s2291_s30, 0  ;;  %p209_p2 = scmp.lt.s32.totalorder %s2215_s27, 3 }
   0xb   : > { %s2218_s9 = smov [#allocation8]   ;;  %s2219_s12 = smov [#allocation11]  }
   0xc   : > { %p2298_p3 = pnand %p1257_p0, %p209_p2  ;;  %s245_s10 = sshll.u32 %s2218_s9, 4  ;;  %s2311_s10 = int_to_ptr.vmem [resolvable:$true] %s245_s10 }
   0xd   : > { %s269_s13 = sshll.u32 %s2219_s12, 4  ;;  %s1939_s16 = scalar_lea.hbm %s2655_s1, 256  ;;  %s2313_s13 = int_to_ptr.vmem [resolvable:$true] %s269_s13 }
   0xe   : > { %s2666_s8 = scalar_select %p2298_p3, 1, 0 }
   0xf   : > { %p1855_p5 = pneg %p2298_p3  ;;  %p1940_p7 = scmp.ne.s32.totalorder %s2655_s1, %s1939_s16 }
  0x10   : > { %p1946_p11 = scmp.lt.u32.totalorder %s1939_s16, %s2655_s1 }
  0x11   : > { %p2307_p6 = pnand %p1855_p5, %p2662_p1 }
  0x13   : > { %p2323_p8 = pneg %p2307_p6 }
  0x15   : > { %p1942_p9 = pnand %p2323_p8, %p1940_p7 }
  0x17   : > { %p1943_p10 = pneg %p1942_p9 }
  0x19   : > { %p1948_p12 = pnand %p1946_p11, %p1943_p10 }
  0x1b   : > { %1951 = shalt.err (!%p1948_p12)
}
  0x1c   : > { %s1952_s22 = scalar_lea.vmem %s2296_s29, 256  ;;  %p1960_p5 = scmp.lt.s32.totalorder %s2296_s29, %s2296_s29 }
  0x1d   : > { %p1953_p13 = scmp.ne.s32.totalorder %s2296_s29, %s1952_s22  ;;  %p1961_p4 = scmp.lt.s32.totalorder %s1952_s22, %s1952_s22 }
  0x1f   : > { %p1955_p0 = pnand %p1953_p13, %p2323_p8  ;;  %p1962_p7 = por %p1961_p4, %p1960_p5 }
  0x21   : > { %p1956_p2 = pneg %p1955_p0 }
  0x23   : > { %p1963_p9 = pnand %p1962_p7, %p1956_p2 }
  0x25   : > { %1966 = shalt.err (!%p1963_p9)
}
  0x26   : > { %s2664_s23 = smov 128   ;;  %s2221_s28 = smov 8  }
  0x27   : > { %1858 = dma.hbm_to_vmem [thread:$0]  (!%p2307_p6), %s2655_s1, 256, %s2296_s29, [#allocation6], %s2664_s23, %s2664_s23, %s2221_s28  }
  0x28   : > { %s1967_s16 = scalar_lea.hbm %s2657_s3, 6144 }
  0x29   : > { %p1968_p4 = scmp.ne.s32.totalorder %s2657_s3, %s1967_s16  ;;  %p1974_p12 = scmp.lt.u32.totalorder %s1967_s16, %s2657_s3 }
  0x2b   : > { %p1970_p10 = pnand %p1968_p4, %p2323_p8 }
  0x2d   : > { %p1971_p11 = pneg %p1970_p10 }
  0x2f   : > { %p1976_p13 = pnand %p1974_p12, %p1971_p11 }
  0x31   : > { %1979 = shalt.err (!%p1976_p13)
}
  0x32   : > { %s1980_s29 = scalar_lea.vmem %s2311_s10, 6144  ;;  %p1988_p7 = scmp.lt.s32.totalorder %s2311_s10, %s2311_s10 }
  0x33   : > { %p1981_p0 = scmp.ne.s32.totalorder %s2311_s10, %s1980_s29  ;;  %p1989_p9 = scmp.lt.s32.totalorder %s1980_s29, %s1980_s29 }
  0x35   : > { %p1983_p2 = pnand %p1981_p0, %p2323_p8  ;;  %p1990_p4 = por %p1989_p9, %p1988_p7 }
  0x37   : > { %p1984_p5 = pneg %p1983_p2 }
  0x39   : > { %p1991_p10 = pnand %p1990_p4, %p1984_p5 }
  0x3b   : > { %1994 = shalt.err (!%p1991_p10)
}
  0x3c   : > { %1864 = dma.hbm_to_vmem [thread:$0]  (!%p2307_p6), %s2657_s3, 6144, %s2311_s10, [#allocation9], %s2664_s23, %s2664_s23, %s2221_s28  }
  0x3d   : > { %s1995_s15 = scalar_lea.hbm %s2659_s5, 6144 }
  0x3e   : > { %p1996_p11 = scmp.ne.s32.totalorder %s2659_s5, %s1995_s15  ;;  %p2002_p0 = scmp.lt.u32.totalorder %s1995_s15, %s2659_s5 }
  0x40   : > { %p1998_p12 = pnand %p1996_p11, %p2323_p8 }
  0x42   : > { %p1999_p13 = pneg %p1998_p12 }
  0x44   : > { %p2004_p2 = pnand %p2002_p0, %p1999_p13 }
  0x46   : > { %2007 = shalt.err (!%p2004_p2)
}
  0x47   : > { %s2008_s10 = scalar_lea.vmem %s2313_s13, 6144  ;;  %p2016_p4 = scmp.lt.s32.totalorder %s2313_s13, %s2313_s13 }
  0x48   : > { %p2009_p5 = scmp.ne.s32.totalorder %s2313_s13, %s2008_s10  ;;  %p2017_p10 = scmp.lt.s32.totalorder %s2008_s10, %s2008_s10 }
  0x4a   : > { %p2011_p7 = pnand %p2009_p5, %p2323_p8  ;;  %p2018_p11 = por %p2017_p10, %p2016_p4 }
  0x4c   : > { %p2012_p9 = pneg %p2011_p7 }
  0x4e   : > { %p2019_p12 = pnand %p2018_p11, %p2012_p9 }
  0x50   : > { %2022 = shalt.err (!%p2019_p12)
}
  0x51   : > { %1870 = dma.hbm_to_vmem [thread:$0]  (!%p2307_p6), %s2659_s5, 6144, %s2313_s13, [#allocation12], %s2664_s23, %s2664_s23, %s2221_s28  }
  0x52   : > { %s2222_s22 = smov [#allocation7]   ;;  %s2223_s12 = smov [#allocation10]  }
  0x53   : > { %s235_s9 = sshll.u32 %s2222_s22, 4  ;;  %s259_s14 = sshll.u32 %s2223_s12, 4  ;;  %s236_s9 = int_to_ptr.vmem [resolvable:$true] %s235_s9  ;;  %s260_s14 = int_to_ptr.vmem [resolvable:$true] %s259_s14 }
  0x54   : > { %s2023_s17 = scalar_lea.hbm %s2656_s2, 16 }
  0x55   : > { %p2024_p13 = scmp.ne.s32.totalorder %s2656_s2, %s2023_s17  ;;  %p2030_p5 = scmp.lt.u32.totalorder %s2023_s17, %s2656_s2 }
  0x57   : > { %p2026_p0 = pnand %p2024_p13, %p2323_p8 }
  0x59   : > { %p2027_p2 = pneg %p2026_p0 }
  0x5b   : > { %p2032_p7 = pnand %p2030_p5, %p2027_p2 }
  0x5d   : > { %2035 = shalt.err (!%p2032_p7)
}
  0x5e   : > { %s2036_s13 = scalar_lea.vmem %s236_s9, 16  ;;  %s2043_s29 = scalar_lea.vmem %s236_s9, 32 }
  0x5f   : > { %p2037_p9 = scmp.ne.s32.totalorder %s236_s9, %s2036_s13  ;;  %p2044_p11 = scmp.lt.s32.totalorder %s236_s9, %s236_s9 }
  0x60   : > { %p2045_p12 = scmp.lt.s32.totalorder %s2043_s29, %s2036_s13 }
  0x61   : > { %p2039_p4 = pnand %p2037_p9, %p2323_p8 }
  0x62   : > { %p2046_p1 = por %p2045_p12, %p2044_p11 }
  0x63   : > { %p2040_p10 = pneg %p2039_p4 }
  0x65   : > { %p2047_p3 = pnand %p2046_p1, %p2040_p10 }
  0x67   : > { %2050 = shalt.err (!%p2047_p3)
}
  0x68   : > { %1861 = dma.hbm_to_vmem [thread:$0]  (!%p2307_p6), %s2656_s2, 16, %s236_s9, [#allocation6]  }
  0x69   : > { %s2051_s17 = scalar_lea.hbm %s2658_s4, 16 }
  0x6a   : > { %p2052_p13 = scmp.ne.s32.totalorder %s2658_s4, %s2051_s17  ;;  %p2058_p3 = scmp.lt.u32.totalorder %s2051_s17, %s2658_s4 }
  0x6c   : > { %p2054_p0 = pnand %p2052_p13, %p2323_p8 }
  0x6e   : > { %p2055_p1 = pneg %p2054_p0 }
  0x70   : > { %p2060_p2 = pnand %p2058_p3, %p2055_p1 }
  0x72   : > { %2063 = shalt.err (!%p2060_p2)
}
  0x73   : > { %s2064_s13 = scalar_lea.vmem %s260_s14, 16  ;;  %s2071_s9 = scalar_lea.vmem %s260_s14, 32 }
  0x74   : > { %p2065_p5 = scmp.ne.s32.totalorder %s260_s14, %s2064_s13  ;;  %p2072_p4 = scmp.lt.s32.totalorder %s260_s14, %s260_s14 }
  0x75   : > { %p2073_p10 = scmp.lt.s32.totalorder %s2071_s9, %s2064_s13 }
  0x76   : > { %p2067_p7 = pnand %p2065_p5, %p2323_p8 }
  0x77   : > { %p2074_p11 = por %p2073_p10, %p2072_p4 }
  0x78   : > { %p2068_p9 = pneg %p2067_p7 }
  0x7a   : > { %p2075_p12 = pnand %p2074_p11, %p2068_p9 }
  0x7c   : > { %2078 = shalt.err (!%p2075_p12)
}
  0x7d   : > { %1867 = dma.hbm_to_vmem [thread:$0]  (!%p2307_p6), %s2658_s4, 16, %s260_s14, [#allocation9]  }
  0x7e   : > { %s2224_s12 = smov [#allocation13]   ;;  %s2079_s18 = scalar_lea.hbm %s2660_s6, 16 }
  0x7f   : > { %s283_s15 = sshll.u32 %s2224_s12, 4  ;;  %p2080_p13 = scmp.ne.s32.totalorder %s2660_s6, %s2079_s18  ;;  %s284_s15 = int_to_ptr.vmem [resolvable:$true] %s283_s15 }
  0x80   : > { %p2086_p3 = scmp.lt.u32.totalorder %s2079_s18, %s2660_s6 }
  0x81   : > { %p2082_p0 = pnand %p2080_p13, %p2323_p8 }
  0x83   : > { %p2083_p1 = pneg %p2082_p0 }
  0x85   : > { %p2088_p2 = pnand %p2086_p3, %p2083_p1 }
  0x87   : > { %2091 = shalt.err (!%p2088_p2)
}
  0x88   : > { %s2092_s14 = scalar_lea.vmem %s284_s15, 16  ;;  %s2099_s9 = scalar_lea.vmem %s284_s15, 32 }
  0x89   : > { %p2093_p5 = scmp.ne.s32.totalorder %s284_s15, %s2092_s14  ;;  %p2100_p4 = scmp.lt.s32.totalorder %s284_s15, %s284_s15 }
  0x8a   : > { %p2101_p10 = scmp.lt.s32.totalorder %s2099_s9, %s2092_s14 }
  0x8b   : > { %p2095_p7 = pnand %p2093_p5, %p2323_p8 }
  0x8c   : > { %p2102_p11 = por %p2101_p10, %p2100_p4 }
  0x8d   : > { %p2096_p9 = pneg %p2095_p7 }
  0x8f   : > { %p2103_p12 = pnand %p2102_p11, %p2096_p9 }
  0x91   : > { %2106 = shalt.err (!%p2103_p12)
}
  0x92   : > { %1873 = dma.hbm_to_vmem [thread:$0]  (!%p2307_p6), %s2660_s6, 16, %s284_s15, [#allocation12]  }
  0x93   : > { %s1256_s19 = sadd.s32 4294967294, %s2215_s27   ;;  %s2455_s11 = sadd.s32 1, %s2215_s27  }
  0x94   : > { %s30_s12 = ssub.s32 %s2215_s27, %s2455_s11  ;;  %s33_s16 = sadd.s32 1, %s2211_s26 }
  0x95   : > { %p31_p8 = scmp.eq.s32.totalorder %s30_s12, 0  ;;  %p40_p13 = scmp.ne.s32.totalorder %s2211_s26, %s2207_s25 }
  0x96   : > { %p41_p0 = scmp.eq.s32.totalorder %s2215_s27, 0  ;;  %p46_p1 = scmp.ne.s32.totalorder %s2207_s25, %s2203_s24 }
  0x97   : > { %s2466_s17 = scalar_select %p31_p8, %s2211_s26, %s33_s16  }
  0x98   : > { %p2468_p3 = por %p41_p0, %p40_p13  ;;  %p2670_p2 = scmp.eq.s32.totalorder %s2291_s30, 0 }
  0x99   : > { %p196_p5 = scmp.eq.s32.totalorder %s2291_s30, 1  ;;  %p202_p7 = scmp.eq.s32.totalorder %s1256_s19, 1 }
  0x9a   : > { %p2474_p6 = por %p2670_p2, %p46_p1  ;;  %p1888_p9 = scmp.lt.s32.totalorder %s2215_s27, 2 }
  0x9b   : > { %s294_s20 = sand.u32 1, %s2211_s26   ;;  %p2481_p4 = por %p196_p5, %p40_p13 }
  0x9c   : > { %p2485_p10 = por %p202_p7, %p46_p1  ;;  %s1265_s13 = sshll.u32 %s294_s20, 4 }
  0x9d   : > { %s2672_s10 = scalar_select %p2481_p4, 1, 0 }
  0x9e   : > { %s2673_s21 = scalar_select %p2485_p10, 1, 0 }
  0x9f   : > { %s1290_s14 = sshll.u32 %s2215_s27, 8  ;;  %s298_s19 = scalar_lea.vmem [#allocation2], %s1265_s13 }
  0xa0   : > { %s2493_s22 = scalar_lea.hbm %s2654_s0, %s1290_s14  ;;  %s305_s12 = sshll.u32 %s298_s19, 4  ;;  %s2495_s12 = int_to_ptr.vmem [resolvable:$true] %s305_s12 }
  0xa1   : > { %p2499_p11 = pnand %p1888_p9, %p2468_p3  ;;  %s2503_s23 = scalar_lea.sflag [#allocation3], %s294_s20 }
  0xa2   : > { %s2107_s9 = scalar_lea.hbm %s2493_s22, 256  ;;  %s2112_s18 = scalar_lea.hbm %s2654_s0, 512 }
  0xa3   : > { %p2108_p12 = scmp.ne.s32.totalorder %s2493_s22, %s2107_s9  ;;  %p2109_p8 = pneg %p2499_p11 }
  0xa4   : > { %p2113_p1 = scmp.lt.u32.totalorder %s2493_s22, %s2654_s0  ;;  %p2114_p3 = scmp.lt.u32.totalorder %s2112_s18, %s2107_s9 }
  0xa5   : > { %p2110_p13 = pnand %p2109_p8, %p2108_p12  ;;  %p2116_p5 = scmp.lt.u32.totalorder %s2107_s9, %s2493_s22 }
  0xa6   : > { %p2115_p2 = por %p2114_p3, %p2113_p1 }
  0xa7   : > { %p2111_p0 = pneg %p2110_p13 }
  0xa8   : > { %p2117_p7 = por %p2116_p5, %p2115_p2 }
  0xaa   : > { %p2118_p9 = pnand %p2117_p7, %p2111_p0 }
  0xac   : > { %2121 = shalt.err (!%p2118_p9)
}
  0xad   : > { %s2122_s20 = scalar_lea.vmem %s2495_s12, 256  ;;  %s2225_s13 = smov [#allocation2]  }
  0xae   : > { %p2123_p12 = scmp.ne.s32.totalorder %s2495_s12, %s2122_s20  ;;  %s2127_s14 = sshll.u32 %s2225_s13, 4  ;;  %s2128_s14 = int_to_ptr.vmem [resolvable:$false] %s2127_s14 }
  0xaf   : > { %s2129_s29 = scalar_lea.vmem %s2128_s14, 512  ;;  %p2130_p4 = scmp.lt.s32.totalorder %s2495_s12, %s2128_s14 }
  0xb0   : > { %p2125_p13 = pnand %p2123_p12, %p2109_p8  ;;  %p2131_p1 = scmp.lt.s32.totalorder %s2129_s29, %s2122_s20 }
  0xb2   : > { %p2126_p10 = pneg %p2125_p13  ;;  %p2132_p3 = por %p2131_p1, %p2130_p4 }
  0xb4   : > { %p2133_p2 = pnand %p2132_p3, %p2126_p10 }
  0xb6   : > { %2136 = shalt.err (!%p2133_p2)
}
  0xb7   : > { %s2675_s9 = smov 128   ;;  %p2676_p8 = scmp.ne.s32.totalorder %s2666_s8, 0 }
  0xb8   : > { %1877 = dma.hbm_to_vmem [thread:$0]  (!%p2499_p11), %s2493_s22, 256, %s2495_s12, %s2503_s23, %s2675_s9, %s2675_s9, %s2221_s28  }
  0xb9   : > { %317 = sbr.rel (%p2676_p8) target bundleno = 1005 (0x3ed), region = 48  ;;  %s2537_s18 = sand.u32 (!%p2676_p8), 1, %s2207_s25  }
  0xba   : > { %s1269_s19 = sshll.u32 (!%p2676_p8), %s2537_s18, 4  ;;  %s320_s20 = scalar_lea.sflag (!%p2676_p8), [#allocation3], %s2537_s18 }
  0xbb   : > { %s323_s16 = scalar_lea.vmem (!%p2676_p8), [#allocation2], %s1269_s19 }
  0xc0   : > { %2182 = dma.done.wait (%p2474_p6), %s320_s20, 256  }
  0xc1   : > { %2184 = vsyncadd (%p2474_p6), %s320_s20, 4294967040  ;;  %p2677_p4 = scmp.eq.s32.totalorder %s2291_s30, 0 }
  0xc3   : > { %2186 = dma.done.wait (%p2677_p4), [#allocation6], 272   ;;  %p2678_p10 = pmov %p2677_p4 }
  0xc4   : > { %p2679_p11 = pmov %p2677_p4 }
  0xc5   : > { %2188 = vsyncadd (%p2678_p10), [#allocation6], 4294967024 }
  0xc6   : > { %2190 = dma.done.wait (%p2679_p11), [#allocation9], 6160   ;;  %p2680_p0 = pmov %p2677_p4 }
  0xc8   : > { %2192 = vsyncadd (%p2680_p0), [#allocation9], 4294961136  ;;  %p2681_p5 = pmov %p2680_p0 }
  0xc9   : > { %p2682_p7 = pmov %p2680_p0 }
  0xca   : > { %2194 = dma.done.wait (%p2681_p5), [#allocation12], 6160  }
  0xcb   : > { %2196 = vsyncadd (%p2682_p7), [#allocation12], 4294961136  ;;  %vm427_vm0 = vcmask 1043456   ;;  %vm420_vm1 = vcmask 97280   ;;  %vm2226_vm2 = vmmov 1   ;;  %v411_v0 = vld [vmem:[#allocation5] sm:$0xff]  ;;  %v380_v53 = vlaneseq }
  0xcc   : > { %vm1622_vm3 = vmpackc.low %vm427_vm0, %vm2226_vm2  ;;  %v412_v1 = vld [vmem:[#allocation5 + $0x8] sm:$0xf]  ;;  %v409_v2 = vld [vmem:[%s323_s16] sm:$0xff]  ;;  %s377_s8 = scalar_lea.vmem [#allocation14], %s1269_s19  ;;  %s1291_s28 = sshll.u32 %s2291_s30, 8 }
  0xcd   : > { %v1621_v3 = vpack.c.bf16 %v412_v1, %v411_v0  ;;  %1408 = vmatprep.mubr.msk.f32.mxu0 %vm420_vm1, %v409_v2  ;;  %v535_v4 = vld [vmem:[#allocation8 + $0x80] sm:$0xff]  ;;  %v536_v5 = vld [vmem:[#allocation8 + $0x88] sm:$0xff]  ;;  %v537_v7 = vld [vmem:[#allocation8 + $0x90] sm:$0xff]  ;;  %v2561_v54 = vshrl.u32 %v380_v53, 7  ;;  %s1126_s23 = sshll.u32 %s377_s8, 4  ;;  %s2608_s12 = scalar_lea.hbm %s2661_s7, %s1291_s28  ;;  %s2603_s23 = int_to_ptr.vmem [resolvable:$true] %s1126_s23 }
  0xce   : > { %v1627_v6 = vpack.c.bf16 %v536_v5, %v535_v4  ;;  %v538_v8 = vld [vmem:[#allocation8 + $0x98] sm:$0xff]  ;;  %v539_v10 = vld [vmem:[#allocation8 + $0xa0] sm:$0xff]  ;;  %v540_v11 = vld [vmem:[#allocation8 + $0xa8] sm:$0xff]  ;;  %s1113_s30 = scalar_lea.sflag [#allocation4], %s2537_s18  ;;  %s2137_s13 = scalar_lea.vmem %s2603_s23, 256 }
  0xcf   : > { %1623 = vmatprep.subr.msk.bf16.mxu0 %vm1622_vm3, %v1621_v3  ;;  %v1631_v9 = vpack.c.bf16 %v538_v8, %v537_v7  ;;  %v410_v12 = vld [vmem:[%s323_s16 + $0x8] sm:$0xff]  ;;  %v1635_v13 = vpack.c.bf16 %v540_v11, %v539_v10  ;;  %v382_v55 = vadd.s32 8, %v2561_v54  ;;  %v1277_v57 = vld [vmem:[#allocation7] ss:$0 sm:$0xff]  ;;  %vm515_vm5 = vcmp.lt.s32.totalorder %v2561_v54, 1  ;;  %p2138_p6 = scmp.ne.s32.totalorder %s2603_s23, %s2137_s13  ;;  %p2685_p9 = scmp.ne.s32.totalorder %s2672_s10, 0 }
  0xd0   : > { %1626 = vmatpush3.bf16.msk.msra.mxu0 %vm1622_vm3, %v1621_v3  ;;  %1628 = vmatprep.subr.bf16.mxu1 %v1627_v6  ;;  %v541_v14 = vld [vmem:[#allocation8 + $0xb0] sm:$0xff]  ;;  %v542_v15 = vld [vmem:[#allocation8 + $0xb8] sm:$0xff]  ;;  %v543_v17 = vld [vmem:[#allocation8 + $0xc0] sm:$0xff]  ;;  %vm703_vm6 = vcmp.lt.s32.totalorder %v2561_v54, 7  ;;  %s2227_s14 = smov [#allocation14]  }
  0xd1   : > { %1630 = vmatpush3.bf16.msra.mxu1 %v1627_v6  ;;  %v1639_v16 = vpack.c.bf16 %v542_v15, %v541_v14  ;;  %v544_v18 = vld [vmem:[#allocation8 + $0xc8] sm:$0xff]  ;;  %v545_v20 = vld [vmem:[#allocation8 + $0xd0] sm:$0xff]  ;;  %v546_v21 = vld [vmem:[#allocation8 + $0xd8] sm:$0xff]  ;;  %v394_v56 = vand.u32 15, %v382_v55  ;;  %p2139_p12 = pnand %p2138_p6, %p2685_p9  ;;  %s2141_s29 = sshll.u32 %s2227_s14, 4  ;;  %s2142_s29 = int_to_ptr.vmem [resolvable:$false] %s2141_s29 }
  0xd2   : > { %1632 = vmatprep.subr.bf16.mxu1 %v1631_v9  ;;  %v1643_v19 = vpack.c.bf16 %v544_v18, %v543_v17  ;;  %v1647_v22 = vpack.c.bf16 %v546_v21, %v545_v20  ;;  %v547_v23 = vld [vmem:[#allocation8 + $0xe0] sm:$0xff]  ;;  %v548_v24 = vld [vmem:[#allocation8 + $0xe8] sm:$0xff]  ;;  %v549_v26 = vld [vmem:[#allocation8 + $0xf0] sm:$0xff]  ;;  %s2143_s9 = scalar_lea.vmem %s2142_s29, 512  ;;  %p2144_p1 = scmp.lt.s32.totalorder %s2603_s23, %s2142_s29 }
  0xd3   : > { %1409 = vmatmul.mubr.msk.f32.vlgmr.msra.gmra.mrb[0].mxu0 %vm420_vm1, %v410_v12  ;;  %v1651_v25 = vpack.c.bf16 %v548_v24, %v547_v23  ;;  %v550_v27 = vld [vmem:[#allocation8 + $0xf8] sm:$0xff]  ;;  %v518_v29 = vld [vmem:[#allocation8] sm:$0xff]  ;;  %v519_v30 = vld [vmem:[#allocation8 + $0x8] sm:$0xff]  ;;  %vm2564_vm4 = vcmp.lt.s32.totalorder %v394_v56, 11  ;;  %p2140_p13 = pneg %p2139_p12  ;;  %p2145_p3 = scmp.lt.s32.totalorder %s2143_s9, %s2137_s13 }
  0xd4   : > { %v1655_v28 = vpack.c.bf16 %v550_v27, %v549_v26  ;;  %v1659_v31 = vpack.c.bf16 %v519_v30, %v518_v29  ;;  %v834_v32 = vld [vmem:[#allocation11 + $0x80] sm:$0xff]  ;;  %v835_v33 = vld [vmem:[#allocation11 + $0x88] sm:$0xff]  ;;  %v836_v34 = vld [vmem:[#allocation11 + $0x90] sm:$0xff] }
  0xd5   : > { %1634 = vmatpush3.bf16.msra.mxu1 %v1631_v9  ;;  %v1723_v35 = vpack.c.bf16 %v835_v33, %v834_v32  ;;  %v837_v36 = vld [vmem:[#allocation11 + $0x98] sm:$0xff]  ;;  %v838_v38 = vld [vmem:[#allocation11 + $0xa0] sm:$0xff]  ;;  %v839_v39 = vld [vmem:[#allocation11 + $0xa8] sm:$0xff]  ;;  %p2146_p2 = por %p2145_p3, %p2144_p1 }
  0xd6   : > { %1636 = vmatprep.subr.bf16.mxu1 %v1635_v13  ;;  %v1727_v37 = vpack.c.bf16 %v837_v36, %v836_v34  ;;  %v1731_v40 = vpack.c.bf16 %v839_v39, %v838_v38  ;;  %v840_v41 = vld [vmem:[#allocation11 + $0xb0] sm:$0xff]  ;;  %v841_v42 = vld [vmem:[#allocation11 + $0xb8] sm:$0xff]  ;;  %v842_v44 = vld [vmem:[#allocation11 + $0xc0] sm:$0xff] }
  0xd7   : > { %1724 = vmatprep.subr.bf16.mxu0 %v1723_v35  ;;  %v1735_v43 = vpack.c.bf16 %v841_v42, %v840_v41  ;;  %v843_v45 = vld [vmem:[#allocation11 + $0xc8] sm:$0xff]  ;;  %v844_v47 = vld [vmem:[#allocation11 + $0xd0] sm:$0xff]  ;;  %v845_v48 = vld [vmem:[#allocation11 + $0xd8] sm:$0xff]  ;;  %p2147_p8 = pnand %p2146_p2, %p2140_p13 }
  0xd8   : > { %1726 = vmatpush3.bf16.msra.mxu0 %v1723_v35  ;;  %v1739_v46 = vpack.c.bf16 %v843_v45, %v842_v44  ;;  %v1743_v49 = vpack.c.bf16 %v845_v48, %v844_v47  ;;  %v846_v50 = vld [vmem:[#allocation11 + $0xe0] sm:$0xff]  ;;  %v847_v51 = vld [vmem:[#allocation11 + $0xe8] sm:$0xff]  ;;  %v521_v61 = vld [vmem:[#allocation8 + $0x18] sm:$0xff] }
  0xd9   : > { %1638 = vmatpush3.bf16.msra.mxu1 %v1635_v13  ;;  %1728 = vmatprep.subr.bf16.mxu0 %v1727_v37  ;;  %v1747_v52 = vpack.c.bf16 %v847_v51, %v846_v50  ;;  %v520_v60 = vld [vmem:[#allocation8 + $0x10] sm:$0xff]  ;;  %v522_v7 = vld [vmem:[#allocation8 + $0x20] sm:$0xff]  ;;  %v523_v8 = vld [vmem:[#allocation8 + $0x28] sm:$0xff] }
  0xda   : > { %1640 = vmatprep.subr.bf16.mxu1 %v1639_v16  ;;  %v1663_v2 = vpack.c.bf16 %v521_v61, %v520_v60  ;;  %v1667_v13 = vpack.c.bf16 %v523_v8, %v522_v7  ;;  %v524_v14 = vld [vmem:[#allocation8 + $0x30] sm:$0xff]  ;;  %v525_v15 = vld [vmem:[#allocation8 + $0x38] sm:$0xff]  ;;  %v526_v17 = vld [vmem:[#allocation8 + $0x40] sm:$0xff] }
  0xdb   : > { %v527_v18 = vld [vmem:[#allocation8 + $0x48] sm:$0xff]  ;;  %v528_v20 = vld [vmem:[#allocation8 + $0x50] sm:$0xff]  ;;  %v529_v21 = vld [vmem:[#allocation8 + $0x58] sm:$0xff] }
  0xdc   : > { %1730 = vmatpush3.bf16.msra.mxu0 %v1727_v37  ;;  %v530_v23 = vld [vmem:[#allocation8 + $0x60] sm:$0xff]  ;;  %v531_v24 = vld [vmem:[#allocation8 + $0x68] sm:$0xff]  ;;  %v532_v26 = vld [vmem:[#allocation8 + $0x70] sm:$0xff] }
  0xdd   : > { %1642 = vmatpush3.bf16.msra.mxu1 %v1639_v16  ;;  %1732 = vmatprep.subr.bf16.mxu0 %v1731_v40  ;;  %v1671_v16 = vpack.c.bf16 %v525_v15, %v524_v14  ;;  %v533_v27 = vld [vmem:[#allocation8 + $0x78] sm:$0xff]  ;;  %v707_v29 = vld [vmem:[#allocation8 + $0x100] sm:$0xff]  ;;  %v708_v30 = vld [vmem:[#allocation8 + $0x108] sm:$0xff] }
  0xde   : > { %1644 = vmatprep.subr.bf16.mxu1 %v1643_v19  ;;  %v709_v32 = vld [vmem:[#allocation8 + $0x110] sm:$0xff]  ;;  %v710_v33 = vld [vmem:[#allocation8 + $0x118] sm:$0xff]  ;;  %v711_v35 = vld [vmem:[#allocation8 + $0x120] sm:$0xff] }
  0xdf   : > { %v1695_v34 = vpack.c.bf16 %v710_v33, %v709_v32  ;;  %v712_v36 = vld [vmem:[#allocation8 + $0x128] sm:$0xff]  ;;  %v713_v38 = vld [vmem:[#allocation8 + $0x130] sm:$0xff]  ;;  %v714_v39 = vld [vmem:[#allocation8 + $0x138] sm:$0xff] }
  0xe0   : > { %1734 = vmatpush3.bf16.msra.mxu0 %v1731_v40  ;;  %v1699_v37 = vpack.c.bf16 %v712_v36, %v711_v35  ;;  %v1703_v40 = vpack.c.bf16 %v714_v39, %v713_v38  ;;  %v715_v41 = vld [vmem:[#allocation8 + $0x140] sm:$0xff]  ;;  %v716_v42 = vld [vmem:[#allocation8 + $0x148] sm:$0xff]  ;;  %v717_v44 = vld [vmem:[#allocation8 + $0x150] sm:$0xff] }
  0xe1   : > { %1646 = vmatpush3.bf16.msra.mxu1 %v1643_v19  ;;  %1736 = vmatprep.subr.bf16.mxu0 %v1735_v43  ;;  %v1675_v19 = vpack.c.bf16 %v527_v18, %v526_v17  ;;  %v718_v45 = vld [vmem:[#allocation8 + $0x158] sm:$0xff]  ;;  %v719_v47 = vld [vmem:[#allocation8 + $0x160] sm:$0xff]  ;;  %v720_v48 = vld [vmem:[#allocation8 + $0x168] sm:$0xff] }
  0xe2   : > { %1648 = vmatprep.subr.bf16.mxu1 %v1647_v22  ;;  %v721_v50 = vld [vmem:[#allocation8 + $0x170] sm:$0xff]  ;;  %v722_v51 = vld [vmem:[#allocation8 + $0x178] sm:$0xff]  ;;  %v1282_v61 = vld [vmem:[#allocation10] ss:$0 sm:$0xff] }
  0xe3   : > { %v848_v53 = vld [vmem:[#allocation11 + $0xf0] sm:$0xff]  ;;  %v849_v55 = vld [vmem:[#allocation11 + $0xf8] sm:$0xff]  ;;  %v1005_v33 = vld [vmem:[#allocation11 + $0x100] sm:$0xff] }
  0xe4   : > { %1738 = vmatpush3.bf16.msra.mxu0 %v1735_v43  ;;  %v1707_v43 = vpack.c.bf16 %v716_v42, %v715_v41  ;;  %v1751_v56 = vpack.c.bf16 %v849_v55, %v848_v53  ;;  %v1007_v36 = vld [vmem:[#allocation11 + $0x110] sm:$0xff]  ;;  %v1009_v39 = vld [vmem:[#allocation11 + $0x120] sm:$0xff] }
  0xe5   : > { %1650 = vmatpush3.bf16.msra.mxu1 %v1647_v22  ;;  %1740 = vmatprep.subr.bf16.mxu0 %v1739_v46  ;;  %v1679_v22 = vpack.c.bf16 %v529_v21, %v528_v20  ;;  %v824_v20 = vld [vmem:[#allocation11 + $0x38] sm:$0xff]  ;;  %v1011_v42 = vld [vmem:[#allocation11 + $0x130] sm:$0xff] }
  0xe6   : > { %1652 = vmatprep.subr.bf16.mxu1 %v1651_v25  ;;  %v1019_v55 = vld [vmem:[#allocation11 + $0x170] sm:$0xff] }
  0xe8   : > { %1742 = vmatpush3.bf16.msra.mxu0 %v1739_v46  ;;  %v1711_v46 = vpack.c.bf16 %v718_v45, %v717_v44  ;;  %v1013_v45 = vld [vmem:[#allocation11 + $0x140] sm:$0xff] }
  0xe9   : > { %1654 = vmatpush3.bf16.msra.mxu1 %v1651_v25  ;;  %1744 = vmatprep.subr.bf16.mxu0 %v1743_v49  ;;  %v1683_v25 = vpack.c.bf16 %v531_v24, %v530_v23  ;;  %v826_v23 = vld [vmem:[#allocation11 + $0x48] sm:$0xff] }
  0xea   : > { %1656 = vmatprep.subr.bf16.mxu1 %v1655_v28 }
  0xec   : > { %1746 = vmatpush3.bf16.msra.mxu0 %v1743_v49  ;;  %v1715_v49 = vpack.c.bf16 %v720_v48, %v719_v47  ;;  %v1015_v48 = vld [vmem:[#allocation11 + $0x150] sm:$0xff] }
  0xed   : > { %1658 = vmatpush3.bf16.msra.mxu1 %v1655_v28  ;;  %1748 = vmatprep.subr.bf16.mxu0 %v1747_v52  ;;  %v1687_v28 = vpack.c.bf16 %v533_v27, %v532_v26  ;;  %v828_v26 = vld [vmem:[#allocation11 + $0x58] sm:$0xff]  ;;  %v829_v27 = vld [vmem:[#allocation11 + $0x60] sm:$0xff] }
  0xee   : > { %1660 = vmatprep.subr.bf16.mxu1 %v1659_v31 }
  0xf0   : > { %1750 = vmatpush3.bf16.msra.mxu0 %v1747_v52  ;;  %v1719_v52 = vpack.c.bf16 %v722_v51, %v721_v50  ;;  %v1017_v51 = vld [vmem:[#allocation11 + $0x160] sm:$0xff] }
  0xf1   : > { %1752 = vmatprep.subr.bf16.mxu0 %v1751_v56 }
  0xf4   : > { %1754 = vmatpush3.bf16.msra.mxu0 %v1751_v56  ;;  %v1020_v56 = vld [vmem:[#allocation11 + $0x178] sm:$0xff] }
 0x1a6   : > { %v1410_v59 = vpop.f32.mrb[0].mxu0 }
 0x1a7   : > { %v503_v62 = vadd.f32 %v1410_v59, %v1277_v57  ;;  %v497_v63 = vpop.f32.mrb[1].mxu0  ;;  %v818_v59 = vld [vmem:[#allocation11 + $0x8] sm:$0xff] }
 0x1a8   : > { %v498_v0 = vadd.f32 %v1277_v57, %v497_v63  ;;  %v817_v57 = vld [vmem:[#allocation11] sm:$0xff] }
 0x1a9   : > { %v511_v1 = vsel %vm2564_vm4, %v503_v62, 0.0  ;;  %v1755_v60 = vpack.c.bf16 %v818_v59, %v817_v57  ;;  %v1815_v57 = vpack.c.bf16 %v1020_v56, %v1019_v55  ;;  %v1284_v59 = vld [vmem:[#allocation13] ss:$0 sm:$0xff] }
 0x1aa   : > { %v514_v3 = vrot.slane %v511_v1, 7  ;;  %v702_v4 = vrot.slane %v511_v1, 1  ;;  %v513_v5 = vrot.slane %v498_v0, 7  ;;  %v701_v6 = vrot.slane %v498_v0, 1  ;;  %1443 = vmatprep.mubr.f32.mxu1 %v498_v0 }
 0x1ab   : > { %1444 = vmatmul.mubr.msk.f32.vlgmr.msra.gmra.mrb[0].mxu1 %vm2564_vm4, %v503_v62  ;;  %1756 = vmatprep.subr.bf16.mxu0 %v1755_v60 }
 0x1ac   : > { %1662 = vmatpush3.bf16.msra.mxu1 %v1659_v31  ;;  %v517_v9 = vsel %vm515_vm5, %v514_v3, %v513_v5  ;;  %v516_v10 = vsel %vm515_vm5, %v513_v5, %v514_v3  ;;  %v704_v11 = vsel %vm703_vm6, %v701_v6, %v702_v4  ;;  %v2582_v12 = vsel %vm703_vm6, %v702_v4, %v701_v6  ;;  %v820_v3 = vld [vmem:[#allocation11 + $0x18] sm:$0xff] }
 0x1ad   : > { %1478 = vmatprep.mubr.f32.mxu1 %v517_v9  ;;  %1664 = vmatprep.subr.bf16.mxu1 %v1663_v2  ;;  %v1691_v31 = vpack.c.bf16 %v708_v30, %v707_v29  ;;  %v831_v30 = vld [vmem:[#allocation11 + $0x70] sm:$0xff] }
 0x1b0   : > { %1666 = vmatpush3.bf16.msra.mxu1 %v1663_v2  ;;  %v819_v2 = vld [vmem:[#allocation11 + $0x10] sm:$0xff] }
 0x1b1   : > { %1668 = vmatprep.subr.bf16.mxu1 %v1667_v13  ;;  %v1759_v7 = vpack.c.bf16 %v820_v3, %v819_v2 }
 0x1b4   : > { %1670 = vmatpush3.bf16.msra.mxu1 %v1667_v13  ;;  %v822_v13 = vld [vmem:[#allocation11 + $0x28] sm:$0xff] }
 0x1b5   : > { %1672 = vmatprep.subr.bf16.mxu1 %v1671_v16 }
 0x1b8   : > { %1674 = vmatpush3.bf16.msra.mxu1 %v1671_v16 }
 0x1b9   : > { %1676 = vmatprep.subr.bf16.mxu1 %v1675_v19 }
 0x1bc   : > { %1678 = vmatpush3.bf16.msra.mxu1 %v1675_v19  ;;  %v823_v19 = vld [vmem:[#allocation11 + $0x30] sm:$0xff] }
 0x1bd   : > { %1680 = vmatprep.subr.bf16.mxu1 %v1679_v22  ;;  %v1767_v21 = vpack.c.bf16 %v824_v20, %v823_v19 }
 0x1c0   : > { %1682 = vmatpush3.bf16.msra.mxu1 %v1679_v22  ;;  %v825_v22 = vld [vmem:[#allocation11 + $0x40] sm:$0xff] }
 0x1c1   : > { %1684 = vmatprep.subr.bf16.mxu1 %v1683_v25  ;;  %v1771_v24 = vpack.c.bf16 %v826_v23, %v825_v22 }
 0x1c4   : > { %1686 = vmatpush3.bf16.msra.mxu1 %v1683_v25  ;;  %v827_v25 = vld [vmem:[#allocation11 + $0x50] sm:$0xff] }
 0x1c5   : > { %1688 = vmatprep.subr.bf16.mxu1 %v1687_v28  ;;  %v1775_v54 = vpack.c.bf16 %v828_v26, %v827_v25 }
 0x1c8   : > { %1690 = vmatpush3.bf16.msra.mxu1 %v1687_v28  ;;  %v830_v28 = vld [vmem:[#allocation11 + $0x68] sm:$0xff] }
 0x1c9   : > { %1692 = vmatprep.subr.bf16.mxu1 %v1691_v31  ;;  %v1779_v29 = vpack.c.bf16 %v830_v28, %v829_v27 }
 0x1cb   : > { %1479 = vmatmul.mubr.f32.vlgmr.msra.gmra.mrb[0].mxu1 %v516_v10 }
 0x1cc   : > { %1694 = vmatpush3.bf16.msra.mxu1 %v1691_v31  ;;  %1513 = vmatprep.mubr.f32.mxu1 %v704_v11  ;;  %v832_v31 = vld [vmem:[#allocation11 + $0x78] sm:$0xff] }
 0x1cd   : > { %1696 = vmatprep.subr.bf16.mxu1 %v1695_v34  ;;  %v1783_v32 = vpack.c.bf16 %v832_v31, %v831_v30 }
 0x1d0   : > { %1698 = vmatpush3.bf16.msra.mxu1 %v1695_v34  ;;  %v1006_v34 = vld [vmem:[#allocation11 + $0x108] sm:$0xff] }
 0x1d1   : > { %1700 = vmatprep.subr.bf16.mxu1 %v1699_v37  ;;  %v1787_v35 = vpack.c.bf16 %v1006_v34, %v1005_v33 }
 0x1d4   : > { %1702 = vmatpush3.bf16.msra.mxu1 %v1699_v37  ;;  %v1008_v37 = vld [vmem:[#allocation11 + $0x118] sm:$0xff] }
 0x1d5   : > { %1704 = vmatprep.subr.bf16.mxu1 %v1703_v40  ;;  %v1791_v38 = vpack.c.bf16 %v1008_v37, %v1007_v36 }
 0x1d8   : > { %1706 = vmatpush3.bf16.msra.mxu1 %v1703_v40  ;;  %v1010_v40 = vld [vmem:[#allocation11 + $0x128] sm:$0xff] }
 0x1d9   : > { %1708 = vmatprep.subr.bf16.mxu1 %v1707_v43  ;;  %v1795_v41 = vpack.c.bf16 %v1010_v40, %v1009_v39 }
 0x1dc   : > { %1710 = vmatpush3.bf16.msra.mxu1 %v1707_v43  ;;  %v1012_v43 = vld [vmem:[#allocation11 + $0x138] sm:$0xff] }
 0x1dd   : > { %1712 = vmatprep.subr.bf16.mxu1 %v1711_v46  ;;  %v1799_v44 = vpack.c.bf16 %v1012_v43, %v1011_v42 }
 0x1e0   : > { %1714 = vmatpush3.bf16.msra.mxu1 %v1711_v46  ;;  %v1014_v46 = vld [vmem:[#allocation11 + $0x148] sm:$0xff] }
 0x1e1   : > { %1716 = vmatprep.subr.bf16.mxu1 %v1715_v49  ;;  %v1803_v47 = vpack.c.bf16 %v1014_v46, %v1013_v45 }
 0x1e4   : > { %1718 = vmatpush3.bf16.msra.mxu1 %v1715_v49  ;;  %v1016_v49 = vld [vmem:[#allocation11 + $0x158] sm:$0xff] }
 0x1e5   : > { %1720 = vmatprep.subr.bf16.mxu1 %v1719_v52  ;;  %v1807_v50 = vpack.c.bf16 %v1016_v49, %v1015_v48 }
 0x1e8   : > { %1722 = vmatpush3.bf16.msra.mxu1 %v1719_v52  ;;  %v1018_v52 = vld [vmem:[#allocation11 + $0x168] sm:$0xff] }
 0x1e9   : > { %v1811_v53 = vpack.c.bf16 %v1018_v52, %v1017_v51 }
 0x1eb   : > { %1514 = vmatmul.mubr.f32.vlgmr.msra.gmra.mrb[0].mxu1 %v2582_v12  ;;  %v821_v12 = vld [vmem:[#allocation11 + $0x20] sm:$0xff] }
 0x1ec   : > { %v1763_v18 = vpack.c.bf16 %v822_v13, %v821_v12 }
 0x2be   : > { %v1515_v62 = vpop.f32.mrb[0].mxu1 }
 0x2bf   : > { %v807_v63 = vadd.f32 %v1515_v62, %v1282_v61  ;;  %v789_v0 = vpop.f32.mrb[1].mxu1 }
 0x2c0   : > { %v806_v1 = vadd.f32 %v1282_v61, %v789_v0 }
 0x2c1   : > { %v809_v4 = vmax.f32 %v807_v63, 0.0 }
 0x2c2   : > { %v808_v5 = vmax.f32 %v806_v1, 0.0 }
 0x2c3   : > { %v811_v6 = vsel %vm2564_vm4, %v809_v4, 0.0 }
 0x2c4   : > { %v814_v8 = vrot.slane %v811_v6, 7  ;;  %v1001_v9 = vrot.slane %v811_v6, 1  ;;  %v813_v10 = vrot.slane %v808_v5, 7  ;;  %v1000_v11 = vrot.slane %v808_v5, 1  ;;  %1548 = vmatprep.mubr.f32.mxu0 %v808_v5 }
 0x2c5   : > { %1549 = vmatmul.mubr.msk.f32.vlgmr.msra.gmra.mrb[2].mxu0 %vm2564_vm4, %v809_v4 }
 0x2c6   : > { %1758 = vmatpush3.bf16.msra.mxu0 %v1755_v60  ;;  %v816_v14 = vsel %vm515_vm5, %v814_v8, %v813_v10  ;;  %v815_v15 = vsel %vm515_vm5, %v813_v10, %v814_v8  ;;  %v1002_v16 = vsel %vm703_vm6, %v1000_v11, %v1001_v9  ;;  %v2597_v17 = vsel %vm703_vm6, %v1001_v9, %v1000_v11 }
 0x2c7   : > { %1583 = vmatprep.mubr.f32.mxu0 %v816_v14  ;;  %1760 = vmatprep.subr.bf16.mxu0 %v1759_v7 }
 0x2ca   : > { %1762 = vmatpush3.bf16.msra.mxu0 %v1759_v7 }
 0x2cb   : > { %1764 = vmatprep.subr.bf16.mxu0 %v1763_v18 }
 0x2ce   : > { %1766 = vmatpush3.bf16.msra.mxu0 %v1763_v18 }
 0x2cf   : > { %1768 = vmatprep.subr.bf16.mxu0 %v1767_v21 }
 0x2d2   : > { %1770 = vmatpush3.bf16.msra.mxu0 %v1767_v21 }
 0x2d3   : > { %1772 = vmatprep.subr.bf16.mxu0 %v1771_v24 }
 0x2d6   : > { %1774 = vmatpush3.bf16.msra.mxu0 %v1771_v24 }
 0x2d7   : > { %1776 = vmatprep.subr.bf16.mxu0 %v1775_v54 }
 0x2da   : > { %1778 = vmatpush3.bf16.msra.mxu0 %v1775_v54 }
 0x2db   : > { %1780 = vmatprep.subr.bf16.mxu0 %v1779_v29 }
 0x2de   : > { %1782 = vmatpush3.bf16.msra.mxu0 %v1779_v29 }
 0x2df   : > { %1784 = vmatprep.subr.bf16.mxu0 %v1783_v32 }
 0x2e2   : > { %1786 = vmatpush3.bf16.msra.mxu0 %v1783_v32 }
 0x2e3   : > { %1788 = vmatprep.subr.bf16.mxu0 %v1787_v35 }
 0x2e5   : > { %1584 = vmatmul.mubr.f32.vlgmr.msra.gmra.mrb[2].mxu0 %v815_v15 }
 0x2e6   : > { %1790 = vmatpush3.bf16.msra.mxu0 %v1787_v35  ;;  %1618 = vmatprep.mubr.f32.mxu0 %v1002_v16 }
 0x2e7   : > { %1792 = vmatprep.subr.bf16.mxu0 %v1791_v38 }
 0x2ea   : > { %1794 = vmatpush3.bf16.msra.mxu0 %v1791_v38 }
 0x2eb   : > { %1796 = vmatprep.subr.bf16.mxu0 %v1795_v41 }
 0x2ee   : > { %1798 = vmatpush3.bf16.msra.mxu0 %v1795_v41 }
 0x2ef   : > { %1800 = vmatprep.subr.bf16.mxu0 %v1799_v44 }
 0x2f2   : > { %1802 = vmatpush3.bf16.msra.mxu0 %v1799_v44 }
 0x2f3   : > { %1804 = vmatprep.subr.bf16.mxu0 %v1803_v47 }
 0x2f6   : > { %1806 = vmatpush3.bf16.msra.mxu0 %v1803_v47 }
 0x2f7   : > { %1808 = vmatprep.subr.bf16.mxu0 %v1807_v50 }
 0x2fa   : > { %1810 = vmatpush3.bf16.msra.mxu0 %v1807_v50 }
 0x2fb   : > { %1812 = vmatprep.subr.bf16.mxu0 %v1811_v53 }
 0x2fe   : > { %1814 = vmatpush3.bf16.msra.mxu0 %v1811_v53 }
 0x2ff   : > { %1816 = vmatprep.subr.bf16.mxu0 %v1815_v57 }
 0x302   : > { %1818 = vmatpush3.bf16.msra.mxu0 %v1815_v57 }
 0x305   : > { %1619 = vmatmul.mubr.f32.vlgmr.msra.gmra.mrb[2].mxu0 %v2597_v17 }
 0x3d8   : > { %v1620_v60 = vpop.f32.mrb[2].mxu0 }
 0x3d9   : > { %v1105_v61 = vadd.f32 %v1620_v60, %v1284_v59  ;;  %v1087_v62 = vpop.f32.mrb[3].mxu0 }
 0x3da   : > { %v1104_v63 = vadd.f32 %v1284_v59, %v1087_v62 }
 0x3db   : > { %v1107_v0 = vmax.f32 %v1105_v61, 0.0 }
 0x3dc   : > { %v1106_v1 = vmax.f32 %v1104_v63, 0.0 }
 0x3dd   : > { %v1109_v2 = vsel %vm2564_vm4, %v1107_v0, 0.0 }
 0x3de   : > { %1111 = vst [vmem:[%s377_s8 + $0x8] sm:$0xff] %v1109_v2  ;;  %1110 = vst [vmem:[%s377_s8] sm:$0xff] %v1106_v1 }
 0x3df   : > { %2150 = shalt.err (!%p2147_p8)
}
 0x3e0   : > { %s2151_s19 = scalar_lea.hbm %s2608_s12, 256  ;;  %s2155_s8 = scalar_lea.hbm %s2661_s7, 512 }
 0x3e1   : > { %p2152_p4 = scmp.ne.s32.totalorder %s2608_s12, %s2151_s19  ;;  %p2156_p0 = scmp.lt.u32.totalorder %s2608_s12, %s2661_s7 }
 0x3e2   : > { %p2157_p5 = scmp.lt.u32.totalorder %s2155_s8, %s2151_s19  ;;  %p2159_p6 = scmp.lt.u32.totalorder %s2151_s19, %s2608_s12 }
 0x3e3   : > { %p2153_p10 = pnand %p2152_p4, %p2685_p9 }
 0x3e4   : > { %p2158_p7 = por %p2157_p5, %p2156_p0 }
 0x3e5   : > { %p2154_p11 = pneg %p2153_p10 }
 0x3e6   : > { %p2160_p12 = por %p2159_p6, %p2158_p7 }
 0x3e8   : > { %p2161_p13 = pnand %p2160_p12, %p2154_p11 }
 0x3ea   : > { %2164 = shalt.err (!%p2161_p13)
}
 0x3eb   : > { %s2228_s22 = smov 128   ;;  %s2229_s13 = smov 8  }
 0x3ec   : > { %1853 = dma.vmem_to_hbm [thread:$0]  (%p2685_p9), %s2603_s23, 256, %s2608_s12, %s1113_s30, %s2228_s22, %s2228_s22, %s2229_s13  }
 0x3ed PF: > { %s1141_s14 = sand.u32 1, %s2203_s24   ;;  %p2686_p1 = scmp.ne.s32.totalorder %s2673_s21, 0 }
 0x3ee   : > { %p2687_p3 = scmp.ge.s32.totalorder %s2215_s27, 2  ;;  %s1142_s29 = scalar_lea.sflag [#allocation4], %s1141_s14 }
 0x3f0   : > { %p1879_p2 = pnand %p2687_p3, %p2686_p1 }
 0x3f2   : > { %2198 = dma.done.wait (!%p1879_p2), %s1142_s29, 256  }
 0x3f3   : > { %2200 = vsyncadd (!%p1879_p2), %s1142_s29, 4294967040  ;;  %p23_p8 = scmp.ge.s32.totalorder %s2455_s11, 4   ;;  %s2688_s24 = smov %s2207_s25 }
 0x3f4   : > { %s2689_s25 = smov %s2211_s26  ;;  %s2690_s26 = smov %s2466_s17 }
 0x3f5   : > { %s2691_s27 = smov %s2455_s11  ;;  %25 = sbr.rel (!%p23_p8) target bundleno = 8 (0x8), region = 121 }
 0x3fc   :  { %1147 = vsyncpa [#allocation3], 1 }
 0x3fd   :  { %1149 = vsyncpa [#allocation3 + $0x1], 1 }
 0x3fe   :  { %1150 = vsyncpa [#allocation6], 1 }
 0x3ff   :  { %1151 = vsyncpa [#allocation9], 1 }
 0x400   :  { %1152 = vsyncpa [#allocation12], 1 }
 0x401   :  { %1153 = vsyncpa [#allocation4], 1 }
 0x402   :  { %1155 = vsyncpa [#allocation4 + $0x1], 1 }

</bundles_post_ra>
